<compile_context>
chip_gen: v5e
topology: v5e:2x2
jax: 0.10.0
libtpu: 0.0.40
codegen_flags: <defaults>
</compile_context>

<pallas_src>
import functools

import numpy as np
import jax
import jax.numpy as jnp
from jax.experimental import pallas as pl
from jax.experimental.pallas import tpu as pltpu


LANE = 128
Q_TILE_MAX = 8 * 1024   # cap on the lane-dense Q tile; keeps the (B, C, q_tile) out
                        # block (double-buffered) tiny even on v7x's 64 MiB VMEM.


# ---------------------------------------------------------------------------
# Pallas kernel: fused (1x1 conv projection) + (bilinear resample), sparse 2-D branch.
#   proj = F (B, D) @ Wt (D, C)                          -> one MXU pass, f32 acc
#   out[b, c, q] = proj[b, c] * m0[q] + bias[c]          -> VPU broadcast mul-add
# The output block is lane-dense (Q tile on the last axis, multiple of 128).
# ---------------------------------------------------------------------------
def proj_interp_kernel(f_ref, wt_ref, bias_ref, m0_ref, out_ref):
    # f_ref   : (B, D)        lane-dense features, whole batch in one step
    # wt_ref  : (D, C)        Conv2d 1x1 weight, transposed (no bias)
    # bias_ref: (1, C)        Conv2d bias
    # m0_ref  : (1, Qt)       column-0 bilinear weights for this Q tile (zero-padded)
    # out_ref : (B, C, Qt)
    proj = jnp.dot(f_ref[...], wt_ref[...], preferred_element_type=jnp.float32)  # (B, C)
    out = (proj[:, :, None] * m0_ref[...][None, :, :]      # (B,C,1)*(1,1,Qt) -> (B,C,Qt)
           + bias_ref[...][:, :, None])                    # + (1,C,1): rows of Lh/Lw sum to 1
    out_ref[...] = out.astype(out_ref.dtype)


def fused_project_and_interpolate(features, wt, bias2d, m0p, q_tile):
    B, D = features.shape
    C = wt.shape[1]
    QP = m0p.shape[1]
    assert QP % q_tile == 0 and q_tile % LANE == 0
    # Single grid step for the small config (QP <= Q_TILE_MAX); for large targets the
    # Q axis is tiled into independent lane-dense chunks ("parallel": both v7x TCs get
    # work; on v5e/v6e it is a serial loop whose compute is still trivial).
    grid = (QP // q_tile,)
    return pl.pallas_call(
        proj_interp_kernel,
        out_shape=jax.ShapeDtypeStruct((B, C, QP), jnp.float32),
        grid=grid,
        in_specs=[
            pl.BlockSpec((B, D), lambda q: (0, 0)),
            pl.BlockSpec((D, C), lambda q: (0, 0)),
            pl.BlockSpec((1, C), lambda q: (0, 0)),
            pl.BlockSpec((1, q_tile), lambda q: (0, q)),
        ],
        out_specs=pl.BlockSpec((B, C, q_tile), lambda q: (0, 0, q)),
        compiler_params=pltpu.CompilerParams(dimension_semantics=("parallel",)),
    )(features, wt, bias2d, m0p)


# ---------------------------------------------------------------------------
# Static interpolation constants (PyTorch align_corners=False), hoisted out of the
# per-call path and computed in numpy once at setup time.
# ---------------------------------------------------------------------------
def bilinear_matrix(out_size, in_size):
    """Dense bilinear resample matrix with PyTorch align_corners=False semantics (numpy)."""
    i = np.arange(out_size, dtype=np.float64)
    scale = in_size / out_size
    src = np.maximum((i + 0.5) * scale - 0.5, 0.0)
    i0 = np.minimum(np.floor(src).astype(np.int64), in_size - 1)
    i1 = np.minimum(i0 + 1, in_size - 1)
    w1 = src - i0
    w0 = 1.0 - w1
    m = np.zeros((out_size, in_size), np.float64)
    np.add.at(m, (np.arange(out_size), i0), w0)
    np.add.at(m, (np.arange(out_size), i1), w1)
    return m


def precompute_resample_constants(target_size):
    """Only column 0 of the separable resample matrices is needed (input pixel (0,0) is
    the only nonzero of the zero-padded feature map).  m0 is padded with zeros up to a
    lane-dense length (multiple of 128, and of the Q tile) so kernel stores stay unmasked."""
    Ht, Wt = target_size
    # TODO(synk): the module zero-pads the (B, D, 1, 1) features to a SQUARE
    # (target_size[0], target_size[0]) map (H = W = target_size[0]); verify against the
    # real PyTorch module for non-square targets.
    H = W = target_size[0]
    lh0 = bilinear_matrix(Ht, H)[:, 0]
    lw0 = bilinear_matrix(Wt, W)[:, 0]
    m0 = np.kron(lh0, lw0).astype(np.float32)            # (Q,), row-major over (Ht, Wt)
    Q = m0.shape[0]
    QP = ((Q + LANE - 1) // LANE) * LANE                 # pad to multiple of 128
    if QP <= Q_TILE_MAX:
        q_tile = QP
    else:
        q_tile = Q_TILE_MAX
        QP = ((QP + q_tile - 1) // q_tile) * q_tile      # pad to multiple of the tile
    m0p = np.zeros((1, QP), np.float32)
    m0p[0, :Q] = m0
    return jnp.asarray(m0p), Q, q_tile


# ---------------------------------------------------------------------------
# Stand-in for the external vit_model.forward_features(x) (black-box submodule).
# ---------------------------------------------------------------------------
def vit_forward_features_stub(x, patch_w, patch_size):
    # TODO(synk): the real `vit_model` is an external black-box submodule; this is a
    # deterministic stand-in (patch embed + tanh + mean pool) producing 2-D (B, D) features.
    B, Cin, H, W = x.shape
    ph, pw = H // patch_size, W // patch_size
    patches = x.reshape(B, Cin, ph, patch_size, pw, patch_size)
    patches = patches.transpose(0, 2, 4, 1, 3, 5).reshape(B, ph * pw, -1)  # (B, T, Cin*ps*ps)
    emb = jnp.tanh(patches @ patch_w)                                      # (B, T, D)
    return emb.mean(axis=1)                                                # (B, D)


# ---------------------------------------------------------------------------
# Full forward (mirrors ViTFeatureExtractor.forward, 2-D feature branch).
# ---------------------------------------------------------------------------
@functools.partial(jax.jit, static_argnames=("patch_size", "target_size", "q_tile"))
def vit_feature_extractor_forward(x, patch_w, wt, bias2d, m0p, *,
                                  patch_size, target_size, q_tile):
    features = vit_forward_features_stub(x, patch_w, patch_size)    # (B, D)
    B, D = features.shape
    C = wt.shape[1]
    Ht, Wt = target_size
    Q = Ht * Wt
    # TODO(synk): the 3-D (B, D, T) branch of the original module feeds a 3-D tensor to
    # Conv2d (shape mismatch in PyTorch), so it has no well-defined semantics to port.
    out = fused_project_and_interpolate(features, wt, bias2d, m0p, q_tile)   # (B, C, QP)
    out = out[:, :, :Q].reshape(B, C, Ht, Wt)
    return out, features


if __name__ == "__main__":
    # Small, deterministic configuration consistent with the module.
    B, Cin, Himg, Wimg = 2, 3, 16, 16
    patch_size = 4
    embed_dim = 32            # vit.embed_dim
    output_channels = 8
    target_size = (16, 24)    # non-square so the bilinear weights are exercised; Q = 384
    # vim_patches is unused in the 2-D feature branch (kept for fidelity with the module).

    key = jax.random.PRNGKey(0)
    k_x, k_patch, k_w, k_b = jax.random.split(key, 4)

    x = jax.random.normal(k_x, (B, Cin, Himg, Wimg), jnp.float32)            # NCHW input
    patch_w = 0.02 * jax.random.normal(
        k_patch, (Cin * patch_size * patch_size, embed_dim), jnp.float32)
    # Conv2d(embed_dim, output_channels, kernel_size=1): weight (C, D, 1, 1) -> (C, D), bias (C,)
    conv_w = 0.05 * jax.random.normal(k_w, (output_channels, embed_dim), jnp.float32)
    conv_b = 0.05 * jax.random.normal(k_b, (output_channels,), jnp.float32)

    # Static constants / layouts, computed once (hoisted out of the per-call path).
    wt = jnp.asarray(conv_w.T)                 # (D, C)  lane-dense RHS for the projection
    bias2d = jnp.asarray(conv_b)[None, :]      # (1, C)
    m0p, Q, q_tile = precompute_resample_constants(target_size)   # (1, QP), Q, static tile

    out, features = vit_feature_extractor_forward(
        x, patch_w, wt, bias2d, m0p,
        patch_size=patch_size, target_size=target_size, q_tile=q_tile)
    out = jax.block_until_ready(out)

    # --- plain JAX reference of the exact module math (zero-pad + 1x1 conv + bilinear) ---
    Ht, Wt = target_size
    H = W = target_size[0]
    feat_map = jnp.zeros((B, embed_dim, H, W), jnp.float32).at[:, :, 0, 0].set(features)
    proj_ref = jnp.einsum("cd,bdhw->bchw", conv_w, feat_map,
                          precision="highest") + conv_b[None, :, None, None]
    lh = jnp.asarray(bilinear_matrix(Ht, H), jnp.float32)
    lw = jnp.asarray(bilinear_matrix(Wt, W), jnp.float32)
    ref = jnp.einsum("ih,bchw,jw->bcij", lh, proj_ref, lw, precision="highest")

    assert out.shape == (B, output_channels, Ht, Wt)
    assert jnp.allclose(out, ref, atol=1e-5, rtol=1e-5)
    print("KERNEL_OK")
</pallas_src>

<mosaic_0001>
module attributes {stable_mosaic.version = 11 : i64} {
  func.func @proj_interp_kernel(%arg0: i32, %arg1: memref<2x32xf32, #tpu.memory_space<vmem>>, %arg2: memref<32x8xf32, #tpu.memory_space<vmem>>, %arg3: memref<1x8xf32, #tpu.memory_space<vmem>>, %arg4: memref<1x384xf32, #tpu.memory_space<vmem>>, %arg5: memref<2x8x384xf32, #tpu.memory_space<vmem>>) attributes {dimension_semantics = [#tpu.dimension_semantics<parallel>], iteration_bounds = array<i64: 1>, scalar_prefetch = 0 : i64, scratch_operands = 0 : i64, tpu.core_type = #tpu.core_type<tc>, window_params = [{pipeline_mode = #tpu.pipeline_mode<synchronous>, transform_indices = @transform_0, window_bounds = array<i64: 2, 32>}, {pipeline_mode = #tpu.pipeline_mode<synchronous>, transform_indices = @transform_1, window_bounds = array<i64: 32, 8>}, {pipeline_mode = #tpu.pipeline_mode<synchronous>, transform_indices = @transform_2, window_bounds = array<i64: 1, 8>}, {transform_indices = @transform_3, window_bounds = array<i64: 1, 384>}, {transform_indices = @transform_4, window_bounds = array<i64: 2, 8, 384>}]} {
    %c0 = arith.constant 0 : index
    %c0_0 = arith.constant 0 : index
    %0 = vector.load %arg1[%c0, %c0_0] : memref<2x32xf32, #tpu.memory_space<vmem>>, vector<2x32xf32>
    %c0_1 = arith.constant 0 : index
    %c0_2 = arith.constant 0 : index
    %1 = vector.load %arg2[%c0_1, %c0_2] : memref<32x8xf32, #tpu.memory_space<vmem>>, vector<32x8xf32>
    %cst = arith.constant dense<0.000000e+00> : vector<2x8xf32>
    %2 = tpu.matmul %0, %1, %cst {dimension_numbers = #tpu.dot_dimension_numbers<[1], [0], [0], [1], [0, 0, 1, 1], [], []>} : vector<2x32xf32>, vector<32x8xf32>, vector<2x8xf32> -> vector<2x8xf32>
    %3 = vector.shape_cast %2 : vector<2x8xf32> to vector<2x8x1xf32>
    %c0_3 = arith.constant 0 : index
    %c0_4 = arith.constant 0 : index
    %4 = vector.load %arg4[%c0_3, %c0_4] : memref<1x384xf32, #tpu.memory_space<vmem>>, vector<1x384xf32>
    %5 = vector.shape_cast %4 : vector<1x384xf32> to vector<1x1x384xf32>
    %6 = vector.broadcast %3 : vector<2x8x1xf32> to vector<2x8x384xf32>
    %7 = vector.broadcast %5 : vector<1x1x384xf32> to vector<2x8x384xf32>
    %8 = arith.mulf %6, %7 : vector<2x8x384xf32>
    %c0_5 = arith.constant 0 : index
    %c0_6 = arith.constant 0 : index
    %9 = vector.load %arg3[%c0_5, %c0_6] : memref<1x8xf32, #tpu.memory_space<vmem>>, vector<1x8xf32>
    %10 = vector.shape_cast %9 : vector<1x8xf32> to vector<1x8x1xf32>
    %11 = vector.broadcast %10 : vector<1x8x1xf32> to vector<2x8x384xf32>
    %12 = arith.addf %8, %11 : vector<2x8x384xf32>
    %c0_7 = arith.constant 0 : index
    %c0_8 = arith.constant 0 : index
    %c0_9 = arith.constant 0 : index
    %13 = vector.load %arg5[%c0_7, %c0_8, %c0_9] : memref<2x8x384xf32, #tpu.memory_space<vmem>>, vector<2x8x384xf32>
    tpu.vector_store %arg5[%c0_7, %c0_8, %c0_9], %12 {strides = array<i32>} : memref<2x8x384xf32, #tpu.memory_space<vmem>>, vector<2x8x384xf32>,
    return
  }
  func.func @transform_0(%arg0: i32) -> (i32, i32) {
    %c0_i32 = arith.constant 0 : i32
    %c0_i32_0 = arith.constant 0 : i32
    %c0_i32_1 = arith.constant 0 : i32
    return %c0_i32, %c0_i32_0 : i32, i32
  }
  func.func @transform_1(%arg0: i32) -> (i32, i32) {
    %c0_i32 = arith.constant 0 : i32
    %c0_i32_0 = arith.constant 0 : i32
    %c0_i32_1 = arith.constant 0 : i32
    return %c0_i32, %c0_i32_0 : i32, i32
  }
  func.func @transform_2(%arg0: i32) -> (i32, i32) {
    %c0_i32 = arith.constant 0 : i32
    %c0_i32_0 = arith.constant 0 : i32
    %c0_i32_1 = arith.constant 0 : i32
    return %c0_i32, %c0_i32_0 : i32, i32
  }
  func.func @transform_3(%arg0: i32) -> (i32, i32) {
    %c0_i32 = arith.constant 0 : i32
    %c0_i32_0 = arith.constant 0 : i32
    return %c0_i32, %arg0 : i32, i32
  }
  func.func @transform_4(%arg0: i32) -> (i32, i32, i32) {
    %c0_i32 = arith.constant 0 : i32
    %c0_i32_0 = arith.constant 0 : i32
    %c0_i32_1 = arith.constant 0 : i32
    return %c0_i32, %c0_i32_0, %arg0 : i32, i32, i32
  }
}

</mosaic_0001>

<bundles_post_ra>
// kernel: vit_feature_extractor_forward.1
= control target key start
LH: loop header
LB: loop body
LE: loop exit
PB: predicated region body
PF: predicated region fallthrough
CT: control target
= control target key end

     0   :  { %v47_v0 = vlaneseq  ;;  %vm22_vm0 = vcmask 261120   ;;  %s166_s1 = inlined_call_operand.vmem [shape: f32[32,8], index: 1, kind: input, shape index: {}]   ;;  %s167_s0 = inlined_call_operand.vmem [shape: f32[2,32], index: 0, kind: input, shape index: {}]   ;;  %s168_s2 = inlined_call_operand.vmem [shape: f32[1,8], index: 2, kind: input, shape index: {}]   ;;  %s169_s3 = inlined_call_operand.vmem [shape: f32[1,384], index: 3, kind: input, shape index: {}]   ;;  %s170_s4 = inlined_call_operand.vmem [shape: f32[2,8,384], index: 4, kind: output, shape index: {}]  }
   0x1   :  { %v21_v1 = vld [vmem:[%s166_s1 + $0x18] sm:$0xff]  ;;  %v20_v2 = vld [vmem:[%s166_s1 + $0x10] sm:$0xff]  ;;  %v19_v4 = vld [vmem:[%s166_s1 + $0x8] sm:$0xff] }
   0x2   :  { %38 = vmatpush.msra.mxu0 %v21_v1  ;;  %v48_v3 = vshrl.u32 %v47_v0, 7  ;;  %v18_v5 = vld [vmem:[%s166_s1] sm:$0xff] }
   0x3   :  { %v17_v6 = vld [vmem:[%s167_s0] sm:$0x3] }
   0x4   :  { %39 = vmatpush.msra.mxu0 %v20_v2  ;;  %99 = vset.pattern.permute.xlu0 %v48_v3  ;;  %v101_v7 = vld [vmem:[%s168_s2] ss:$0 sm:$0xff] }
   0x5   :  { %100 = vset.pattern.permute.xlu1 %v48_v3  ;;  %v60_v11 = vld [vmem:[%s169_s3] sm:$0x7] }
   0x6   :  { %40 = vmatpush.msra.mxu0 %v19_v4  ;;  %v62_v12 = vperm.slane %v60_v11, 0  ;;  %v63_v13 = vperm.slane %v60_v11, 1  ;;  %v64_v14 = vperm.slane %v60_v11, 2 }
   0x8   :  { %41 = vmatpush.msra.mxu0 %v18_v5 }
   0x9   :  { %98 = vmatmul.msk.f32.vlgmr.msra.gmra.mxu0 %vm22_vm0, %v17_v6 }
   0xd   :  { %80 = vperm.xlu1 %100, %v101_v7  }
  0x7f   :  { %v81_v16 = vpop.permute.xlu1 %80 }
  0x86   :  { %v43_v8 = vpop.f32.mrf.mxu0 }
  0x87   :  { %v46_v9 = vperm.slane %v43_v8, 0  ;;  %v53_v10 = vperm.slane %v43_v8, 1 }
  0x89   :  { %51 = vperm.xlu0 %99, %v46_v9  }
  0x91   :  { %58 = vperm.xlu0 %99, %v53_v10  }
  0xfb   :  { %v52_v15 = vpop.permute.xlu0 %51 }
  0xfc   :  { %v68_v17 = vmul.f32 %v62_v12, %v52_v15  ;;  %v69_v18 = vmul.f32 %v63_v13, %v52_v15  ;;  %v70_v19 = vmul.f32 %v64_v14, %v52_v15 }
  0xfe   :  { %v82_v20 = vadd.f32 %v81_v16, %v68_v17  ;;  %v83_v21 = vadd.f32 %v81_v16, %v69_v18  ;;  %v84_v22 = vadd.f32 %v81_v16, %v70_v19 }
 0x100   :  { %88 = vst [vmem:[%s170_s4] sm:$0xff] %v82_v20 }
 0x101   :  { %89 = vst [vmem:[%s170_s4 + $0x8] sm:$0xff] %v83_v21 }
 0x102   :  { %90 = vst [vmem:[%s170_s4 + $0x10] sm:$0xff] %v84_v22 }
 0x103   :  { %v59_v23 = vpop.permute.xlu0 %58 }
 0x104   :  { %v71_v24 = vmul.f32 %v62_v12, %v59_v23  ;;  %v72_v25 = vmul.f32 %v63_v13, %v59_v23  ;;  %v73_v26 = vmul.f32 %v64_v14, %v59_v23 }
 0x106   :  { %v85_v27 = vadd.f32 %v81_v16, %v71_v24  ;;  %v86_v28 = vadd.f32 %v81_v16, %v72_v25  ;;  %v87_v29 = vadd.f32 %v81_v16, %v73_v26 }
 0x108   :  { %91 = vst [vmem:[%s170_s4 + $0x18] sm:$0xff] %v85_v27 }
 0x109   :  { %92 = vst [vmem:[%s170_s4 + $0x20] sm:$0xff] %v86_v28 }
 0x10a   :  { %93 = vst [vmem:[%s170_s4 + $0x28] sm:$0xff] %v87_v29 }

</bundles_post_ra>
